<compile_context>
chip_gen: v5e
topology: v5e:2x2
jax: 0.10.0
libtpu: 0.0.40
codegen_flags: <defaults>
</compile_context>

<pallas_src>
import functools

import jax
import jax.numpy as jnp
import numpy as np
from jax.experimental import pallas as pl
from jax.experimental.pallas import tpu as pltpu

FOCAL_SCALE = 20.0
DICE_SCALE = 1.0
ALPHA = 0.6
GAMMA = 2            # hard-coded as explicit squaring below (matches module)
EPS = 1e-8
LANE = 128


def _seg_loss_kernel(x_ref, t_ref, focal_ref, dice_ref, *,
                     rows, total_l, need_mask):
    j = pl.program_id(1)

    @pl.when(j == 0)
    def _():
        focal_ref[...] = jnp.zeros_like(focal_ref)
        dice_ref[...] = jnp.zeros_like(dice_ref)

    x = x_ref[0].astype(jnp.float32)      # (rows, 128) logits
    t = t_ref[0].astype(jnp.float32)      # (rows, 128) labels

    # Logit-space focal: one exp + one log (instead of sigmoid + two logs).
    #   p = sigmoid(x), -log(p) = log(1+e), -log(1-p) = x + log(1+e)
    e = jnp.exp(-x)
    p = 1.0 / (1.0 + e)
    sp = jnp.log(1.0 + e)
    omp = 1.0 - p
    f = (ALPHA * (omp * omp) * t * sp
         + (1.0 - ALPHA) * (p * p) * (1.0 - t) * (x + sp))

    # dice intersection element: (1-p)(1-t) + p*t == 1 - p - t + 2*p*t
    d = 1.0 - p - t + 2.0 * p * t

    if need_mask:  # static: emitted only when L was padded to the tile grid
        r_idx = jax.lax.broadcasted_iota(jnp.int32, (rows, LANE), 0)
        l_idx = jax.lax.broadcasted_iota(jnp.int32, (rows, LANE), 1)
        flat = (j * rows + r_idx) * LANE + l_idx
        valid = flat < total_l
        f = jnp.where(valid, f, 0.0)
        d = jnp.where(valid, d, 0.0)

    # Fold the (rows,128) tile into the persistent (8,128) accumulators using
    # sublane-aligned vreg adds only (no XLU work in the steady-state loop).
    focal_ref[0] += f.reshape(rows // 8, 8, LANE).sum(axis=0)
    dice_ref[0] += d.reshape(rows // 8, 8, LANE).sum(axis=0)


def segmentation_loss(output, label):
    """output, label: (N, C, H, W) arrays (f32 or bf16). Returns (loss, focal, dice)."""
    n, c, h, w = output.shape
    l = c * h * w
    tiles = -(-l // LANE)                              # ceil(L / 128) rows
    rows = 512 if tiles >= 512 else ((tiles + 7) // 8) * 8
    rows_total = -(-tiles // rows) * rows              # padded row count
    l_pad = rows_total * LANE
    n_tiles = rows_total // rows
    need_mask = l_pad != l

    out2 = output.reshape(n, l)
    lab2 = label.reshape(n, l)
    if need_mask:
        pad = l_pad - l
        out2 = jnp.pad(out2, ((0, 0), (0, pad)))
        lab2 = jnp.pad(lab2, ((0, 0), (0, pad)))
    out3 = out2.reshape(n, rows_total, LANE)
    lab3 = lab2.reshape(n, rows_total, LANE)

    kernel = functools.partial(_seg_loss_kernel, rows=rows, total_l=l,
                               need_mask=need_mask)

    part_shape = jax.ShapeDtypeStruct((n, 8, LANE), jnp.float32)
    bytes_in = out3.size * out3.dtype.itemsize + lab3.size * lab3.dtype.itemsize

    focal_part, dice_part = pl.pallas_call(
        kernel,
        out_shape=(part_shape, part_shape),
        grid_spec=pltpu.PrefetchScalarGridSpec(
            num_scalar_prefetch=0,
            grid=(n, n_tiles),
            in_specs=[
                pl.BlockSpec((1, rows, LANE), lambda b, j: (b, j, 0)),
                pl.BlockSpec((1, rows, LANE), lambda b, j: (b, j, 0)),
            ],
            out_specs=(
                pl.BlockSpec((1, 8, LANE), lambda b, j: (b, 0, 0)),
                pl.BlockSpec((1, 8, LANE), lambda b, j: (b, 0, 0)),
            ),
        ),
        compiler_params=pltpu.CompilerParams(
            dimension_semantics=("parallel", "arbitrary")),
        cost_estimate=pl.CostEstimate(
            flops=int(18 * n * l_pad),
            transcendentals=int(3 * n * l_pad),
            bytes_accessed=int(bytes_in + 2 * n * 8 * LANE * 4)),
    )(out3, lab3)

    # Tiny final reductions on (N,8,128) partials (plain XLA ops).
    focal_mean = jnp.sum(focal_part) / (n * l)
    inter = jnp.sum(dice_part, axis=(1, 2))            # (N,)
    card = 2.0 * l                                      # (1-p)+p+(1-t)+t == 2
    dice_mean = jnp.mean(2.0 * inter / (card + EPS))
    fc = FOCAL_SCALE * focal_mean
    dc = DICE_SCALE * dice_mean
    return fc + dc, fc, dc


def _reference(output, label):
    """Faithful port of the PyTorch module (sigmoid + eps-inside-log + concat dice)."""
    p = jax.nn.sigmoid(output.astype(jnp.float32))
    t = label.astype(jnp.float32)
    f = (-ALPHA * (1.0 - p) ** GAMMA * t * jnp.log(p + EPS)
         - (1.0 - ALPHA) * p ** GAMMA * (1.0 - t) * jnp.log(1.0 - p + EPS))
    focal = FOCAL_SCALE * jnp.mean(f)
    xc = jnp.concatenate([1.0 - p, p], axis=1)
    yc = jnp.concatenate([1.0 - t, t], axis=1)
    inter = jnp.sum(xc * yc, axis=(1, 2, 3))
    card = jnp.sum(xc + yc, axis=(1, 2, 3))
    dice = DICE_SCALE * jnp.mean(2.0 * inter / (card + EPS))
    return focal + dice, focal, dice


def _check(shape, key):
    k1, k2 = jax.random.split(key)
    logits = jax.random.normal(k1, shape, dtype=jnp.float32)
    # labels are {0,1} -> exact in bf16; halves label HBM traffic.
    labels = jax.random.bernoulli(k2, 0.5, shape).astype(jnp.bfloat16)
    loss, focal, dice = segmentation_loss(logits, labels)
    jax.block_until_ready(loss)
    ref_loss, ref_focal, ref_dice = _reference(logits, labels.astype(jnp.float32))
    np.testing.assert_allclose(np.asarray(loss), np.asarray(ref_loss), rtol=1e-5, atol=1e-5)
    np.testing.assert_allclose(np.asarray(focal), np.asarray(ref_focal), rtol=1e-5, atol=1e-5)
    np.testing.assert_allclose(np.asarray(dice), np.asarray(ref_dice), rtol=1e-5, atol=1e-5)


if __name__ == "__main__":
    key = jax.random.PRNGKey(0)
    ka, kb = jax.random.split(key)
    _check((2, 4, 16, 16), ka)   # lane-aligned case (C*H*W = 1024)
    _check((2, 3, 10, 10), kb)   # unaligned case exercising the padding mask
    print("KERNEL_OK")
</pallas_src>

<mosaic_0001>
module attributes {stable_mosaic.version = 11 : i64} {
  func.func @_seg_loss_kernel(%arg0: i32, %arg1: i32, %arg2: memref<1x8x128xf32, #tpu.memory_space<vmem>>, %arg3: memref<1x8x128xbf16, #tpu.memory_space<vmem>>, %arg4: memref<1x8x128xf32, #tpu.memory_space<vmem>>, %arg5: memref<1x8x128xf32, #tpu.memory_space<vmem>>) attributes {dimension_semantics = [#tpu.dimension_semantics<parallel>, #tpu.dimension_semantics<arbitrary>], iteration_bounds = array<i64: 2, 1>, scalar_prefetch = 0 : i64, scratch_operands = 0 : i64, tpu.core_type = #tpu.core_type<tc>, window_params = [{transform_indices = @transform_0, window_bounds = array<i64: 1, 8, 128>}, {transform_indices = @transform_1, window_bounds = array<i64: 1, 8, 128>}, {transform_indices = @transform_2, window_bounds = array<i64: 1, 8, 128>}, {transform_indices = @transform_3, window_bounds = array<i64: 1, 8, 128>}]} {
    %c0_i32 = arith.constant 0 : i32
    %0 = arith.cmpi eq, %arg1, %c0_i32 : i32
    %1 = arith.extui %0 : i1 to i32
    %c0_i32_0 = arith.constant 0 : i32
    %2 = arith.cmpi ne, %1, %c0_i32_0 : i32
    scf.if %2 {
      %cst_29 = arith.constant 0.000000e+00 : f32
      %57 = vector.broadcast %cst_29 : f32 to vector<1x8x128xf32>
      %c0_30 = arith.constant 0 : index
      %c0_31 = arith.constant 0 : index
      %c0_32 = arith.constant 0 : index
      %58 = vector.load %arg4[%c0_30, %c0_31, %c0_32] : memref<1x8x128xf32, #tpu.memory_space<vmem>>, vector<1x8x128xf32>
      tpu.vector_store %arg4[%c0_30, %c0_31, %c0_32], %57 {strides = array<i32>} : memref<1x8x128xf32, #tpu.memory_space<vmem>>, vector<1x8x128xf32>,
      %cst_33 = arith.constant 0.000000e+00 : f32
      %59 = vector.broadcast %cst_33 : f32 to vector<1x8x128xf32>
      %c0_34 = arith.constant 0 : index
      %c0_35 = arith.constant 0 : index
      %c0_36 = arith.constant 0 : index
      %60 = vector.load %arg5[%c0_34, %c0_35, %c0_36] : memref<1x8x128xf32, #tpu.memory_space<vmem>>, vector<1x8x128xf32>
      tpu.vector_store %arg5[%c0_34, %c0_35, %c0_36], %59 {strides = array<i32>} : memref<1x8x128xf32, #tpu.memory_space<vmem>>, vector<1x8x128xf32>,
    } else {
    }
    %c0 = arith.constant 0 : index
    %c0_1 = arith.constant 0 : index
    %c0_2 = arith.constant 0 : index
    %3 = vector.load %arg2[%c0, %c0_1, %c0_2] : memref<1x8x128xf32, #tpu.memory_space<vmem>>, vector<1x8x128xf32>
    %4 = vector.shape_cast %3 : vector<1x8x128xf32> to vector<8x128xf32>
    %c0_3 = arith.constant 0 : index
    %c0_4 = arith.constant 0 : index
    %c0_5 = arith.constant 0 : index
    %5 = vector.load %arg3[%c0_3, %c0_4, %c0_5] : memref<1x8x128xbf16, #tpu.memory_space<vmem>>, vector<1x8x128xbf16>
    %6 = vector.shape_cast %5 : vector<1x8x128xbf16> to vector<8x128xbf16>
    %7 = arith.extf %6 : vector<8x128xbf16> to vector<8x128xf32>
    %cst = arith.constant 0.000000e+00 : f32
    %8 = vector.broadcast %cst : f32 to vector<8x128xf32>
    %9 = arith.subf %8, %4 : vector<8x128xf32>
    %10 = math.exp %9 : vector<8x128xf32>
    %cst_6 = arith.constant 1.000000e+00 : f32
    %11 = vector.broadcast %cst_6 : f32 to vector<8x128xf32>
    %12 = arith.addf %11, %10 : vector<8x128xf32>
    %cst_7 = arith.constant 1.000000e+00 : f32
    %13 = vector.broadcast %cst_7 : f32 to vector<8x128xf32>
    %14 = arith.divf %13, %12 : vector<8x128xf32>
    %cst_8 = arith.constant 1.000000e+00 : f32
    %15 = vector.broadcast %cst_8 : f32 to vector<8x128xf32>
    %16 = arith.addf %15, %10 : vector<8x128xf32>
    %17 = math.log %16 : vector<8x128xf32>
    %cst_9 = arith.constant 1.000000e+00 : f32
    %18 = vector.broadcast %cst_9 : f32 to vector<8x128xf32>
    %19 = arith.subf %18, %14 : vector<8x128xf32>
    %20 = arith.mulf %19, %19 : vector<8x128xf32>
    %cst_10 = arith.constant 6.000000e-01 : f32
    %21 = vector.broadcast %cst_10 : f32 to vector<8x128xf32>
    %22 = arith.mulf %21, %20 : vector<8x128xf32>
    %23 = arith.mulf %22, %7 : vector<8x128xf32>
    %24 = arith.mulf %23, %17 : vector<8x128xf32>
    %25 = arith.mulf %14, %14 : vector<8x128xf32>
    %cst_11 = arith.constant 4.000000e-01 : f32
    %26 = vector.broadcast %cst_11 : f32 to vector<8x128xf32>
    %27 = arith.mulf %26, %25 : vector<8x128xf32>
    %cst_12 = arith.constant 1.000000e+00 : f32
    %28 = vector.broadcast %cst_12 : f32 to vector<8x128xf32>
    %29 = arith.subf %28, %7 : vector<8x128xf32>
    %30 = arith.mulf %27, %29 : vector<8x128xf32>
    %31 = arith.addf %4, %17 : vector<8x128xf32>
    %32 = arith.mulf %30, %31 : vector<8x128xf32>
    %33 = arith.addf %24, %32 : vector<8x128xf32>
    %cst_13 = arith.constant 1.000000e+00 : f32
    %34 = vector.broadcast %cst_13 : f32 to vector<8x128xf32>
    %35 = arith.subf %34, %14 : vector<8x128xf32>
    %36 = arith.subf %35, %7 : vector<8x128xf32>
    %cst_14 = arith.constant 2.000000e+00 : f32
    %37 = vector.broadcast %cst_14 : f32 to vector<8x128xf32>
    %38 = arith.mulf %37, %14 : vector<8x128xf32>
    %39 = arith.mulf %38, %7 : vector<8x128xf32>
    %40 = arith.addf %36, %39 : vector<8x128xf32>
    %c0_15 = arith.constant 0 : index
    %c0_16 = arith.constant 0 : index
    %c0_17 = arith.constant 0 : index
    %41 = vector.load %arg4[%c0_15, %c0_16, %c0_17] : memref<1x8x128xf32, #tpu.memory_space<vmem>>, vector<1x8x128xf32>
    %42 = vector.shape_cast %41 : vector<1x8x128xf32> to vector<8x128xf32>
    %43 = vector.shape_cast %33 : vector<8x128xf32> to vector<1x8x128xf32>
    %cst_18 = arith.constant dense<0.000000e+00> : vector<8x128xf32>
    %44 = vector.multi_reduction <add>, %43, %cst_18 [0] : vector<1x8x128xf32> to vector<8x128xf32>
    %45 = arith.addf %42, %44 : vector<8x128xf32>
    %c0_19 = arith.constant 0 : index
    %c0_20 = arith.constant 0 : index
    %c0_21 = arith.constant 0 : index
    %46 = vector.load %arg4[%c0_19, %c0_20, %c0_21] : memref<1x8x128xf32, #tpu.memory_space<vmem>>, vector<1x8x128xf32>
    %47 = vector.shape_cast %46 : vector<1x8x128xf32> to vector<8x128xf32>
    %48 = vector.shape_cast %45 : vector<8x128xf32> to vector<1x8x128xf32>
    tpu.vector_store %arg4[%c0_19, %c0_20, %c0_21], %48 {strides = array<i32>} : memref<1x8x128xf32, #tpu.memory_space<vmem>>, vector<1x8x128xf32>,
    %c0_22 = arith.constant 0 : index
    %c0_23 = arith.constant 0 : index
    %c0_24 = arith.constant 0 : index
    %49 = vector.load %arg5[%c0_22, %c0_23, %c0_24] : memref<1x8x128xf32, #tpu.memory_space<vmem>>, vector<1x8x128xf32>
    %50 = vector.shape_cast %49 : vector<1x8x128xf32> to vector<8x128xf32>
    %51 = vector.shape_cast %40 : vector<8x128xf32> to vector<1x8x128xf32>
    %cst_25 = arith.constant dense<0.000000e+00> : vector<8x128xf32>
    %52 = vector.multi_reduction <add>, %51, %cst_25 [0] : vector<1x8x128xf32> to vector<8x128xf32>
    %53 = arith.addf %50, %52 : vector<8x128xf32>
    %c0_26 = arith.constant 0 : index
    %c0_27 = arith.constant 0 : index
    %c0_28 = arith.constant 0 : index
    %54 = vector.load %arg5[%c0_26, %c0_27, %c0_28] : memref<1x8x128xf32, #tpu.memory_space<vmem>>, vector<1x8x128xf32>
    %55 = vector.shape_cast %54 : vector<1x8x128xf32> to vector<8x128xf32>
    %56 = vector.shape_cast %53 : vector<8x128xf32> to vector<1x8x128xf32>
    tpu.vector_store %arg5[%c0_26, %c0_27, %c0_28], %56 {strides = array<i32>} : memref<1x8x128xf32, #tpu.memory_space<vmem>>, vector<1x8x128xf32>,
    return
  }
  func.func @transform_0(%arg0: i32, %arg1: i32) -> (i32, i32, i32) {
    %c0_i32 = arith.constant 0 : i32
    %c0_i32_0 = arith.constant 0 : i32
    return %arg0, %arg1, %c0_i32 : i32, i32, i32
  }
  func.func @transform_1(%arg0: i32, %arg1: i32) -> (i32, i32, i32) {
    %c0_i32 = arith.constant 0 : i32
    %c0_i32_0 = arith.constant 0 : i32
    return %arg0, %arg1, %c0_i32 : i32, i32, i32
  }
  func.func @transform_2(%arg0: i32, %arg1: i32) -> (i32, i32, i32) {
    %c0_i32 = arith.constant 0 : i32
    %c0_i32_0 = arith.constant 0 : i32
    %c0_i32_1 = arith.constant 0 : i32
    return %arg0, %c0_i32, %c0_i32_0 : i32, i32, i32
  }
  func.func @transform_3(%arg0: i32, %arg1: i32) -> (i32, i32, i32) {
    %c0_i32 = arith.constant 0 : i32
    %c0_i32_0 = arith.constant 0 : i32
    %c0_i32_1 = arith.constant 0 : i32
    return %arg0, %c0_i32, %c0_i32_0 : i32, i32, i32
  }
}

</mosaic_0001>

<bundles_post_ra>
// kernel: tpu_custom_call.1
= control target key start
LH: loop header
LB: loop body
LE: loop exit
PB: predicated region body
PF: predicated region fallthrough
CT: control target
= control target key end

     0   :  { %9 = vsyncpa [#allocation3], 0  ;;  %s942_s0 = inlined_call_operand.hbm [shape: f32[2,8,128], index: 0, kind: input, shape index: {}]   ;;  %s943_s1 = inlined_call_operand.hbm [shape: bf16[2,8,128], index: 1, kind: input, shape index: {}]   ;;  %s944_s2 = inlined_call_operand.hbm [shape: f32[2,8,128], index: 2, kind: output, shape index: {0}]   ;;  %s945_s3 = inlined_call_operand.hbm [shape: f32[2,8,128], index: 3, kind: output, shape index: {1}]  }
   0x1   :  { %11 = vsyncpa [#allocation3 + $0x1], 0 }
   0x2   :  { %12 = vsyncpa [#allocation6], 0 }
   0x3   :  { %14 = vsyncpa [#allocation6 + $0x1], 0 }
   0x4   :  { %15 = vsyncpa [#allocation4], 0 }
   0x5   :  { %17 = vsyncpa [#allocation4 + $0x1], 0 }
   0x6   :  { %18 = vsyncpa [#allocation9], 0 }
   0x7   :  { %20 = vsyncpa [#allocation9 + $0x1], 0  ;;  %s779_s12 = smov 0   ;;  %s781_s13 = smov 0  }
   0x8   :  { %s783_s14 = smov 0   ;;  %s785_s15 = smov 0  }
   0x9   :  { %s787_s16 = smov 0   ;;  %s789_s17 = smov 0  }
   0xa LB: > { %s481_s18 = sadd.s32 4294967295, %s757_s17   ;;  %s482_s19 = sadd.s32 4294967294, %s757_s17   ;;  %s757_s17 = sphi %s789_s17, %s26_s17   ;;  %s753_s16 = sphi %s787_s16, %s955_s16   ;;  %s749_s15 = sphi %s785_s15, %s954_s15   ;;  %s745_s14 = sphi %s783_s14, %s953_s14   ;;  %s741_s13 = sphi %s781_s13, %s952_s13   ;;  %s737_s12 = sphi %s779_s12, %s951_s12  }
   0xb   : > { %s38_s20 = sadd.s32 1, %s753_s16  ;;  %s47_s21 = sadd.s32 1, %s745_s14 }
   0xc   : > { %p40_p0 = scmp.ge.s32.totalorder %s38_s20, 2  ;;  %p54_p1 = scmp.ne.s32.totalorder %s745_s14, %s741_s13 }
   0xd   : > { %p55_p2 = scmp.eq.s32.totalorder %s757_s17, 0  ;;  %p60_p3 = scmp.ne.s32.totalorder %s741_s13, %s737_s12 }
   0xe   : > { %s957_s20 = smov (%p40_p0, %s38_s20), 0  ;;  %p61_p5 = scmp.eq.s32.totalorder %s481_s18, 0 }
   0xf   : > { %p820_p4 = por %p55_p2, %p54_p1  ;;  %s42_s23 = ssub.s32 %s753_s16, %s957_s20 }
  0x10   : > { %p112_p6 = scmp.eq.s32.totalorder %s481_s18, 1  ;;  %p45_p7 = scmp.eq.s32.totalorder %s42_s23, 0 }
  0x11   : > { %p826_p8 = por %p61_p5, %p60_p3  ;;  %p118_p10 = scmp.eq.s32.totalorder %s482_s19, 1 }
  0x12   : > { %p830_p9 = por %p112_p6, %p54_p1  ;;  %p484_p12 = scmp.ge.s32.totalorder %s757_s17, 2 }
  0x13   : > { %s835_s26 = scalar_select %p45_p7, %s745_s14, %s47_s21  }
  0x14   : > { %p837_p11 = por %p118_p10, %p60_p3  ;;  %p522_p13 = scmp.lt.s32.totalorder %s757_s17, 2 }
  0x15   : > { %s164_s28 = sand.u32 1, %s745_s14   ;;  %s486_s30 = sshll.u32 %s753_s16, 3 }
  0x16   : > { %s485_s29 = sshll.u32 %s164_s28, 3  ;;  %s173_s6 = scalar_lea.hbm %s942_s0, %s486_s30 }
  0x17   : > { %s168_s7 = scalar_lea.vmem [#allocation2], %s485_s29  ;;  %s175_s9 = sshll.u32 %s173_s6, 4  ;;  %s176_s9 = int_to_ptr.hbm [resolvable:$true] %s175_s9 }
  0x18   : > { %s177_s8 = sshll.u32 %s168_s7, 4  ;;  %p850_p0 = pnand %p522_p13, %p820_p4  ;;  %s178_s8 = int_to_ptr.vmem [resolvable:$true] %s177_s8 }
  0x19   : > { %p489_p1 = scmp.ge.s32.totalorder %s757_s17, 1  ;;  %p202_p2 = scmp.lt.s32.totalorder %s757_s17, 3 }
  0x1a   : > { %s165_s11 = scalar_lea.sflag [#allocation3], %s164_s28  ;;  %s487_s18 = sshll.u32 %s164_s28, 2 }
  0x1b   : > { %511 = dma.hbm_to_vmem [thread:$0]  (!%p850_p0), %s176_s9, 128, %s178_s8, %s165_s11  }
  0x1c   : > { %p203_p3 = pnand %p489_p1, %p202_p2  ;;  %s488_s19 = sshll.u32 %s753_s16, 2 }
  0x1d   : > { %s193_s29 = scalar_lea.hbm %s943_s1, %s488_s19  ;;  %s188_s30 = scalar_lea.vmem [#allocation5], %s487_s18 }
  0x1e   : > { %s197_s22 = sshll.u32 %s188_s30, 4  ;;  %s195_s4 = sshll.u32 %s193_s29, 4  ;;  %s198_s22 = int_to_ptr.vmem [resolvable:$true] %s197_s22  ;;  %s196_s4 = int_to_ptr.hbm [resolvable:$true] %s195_s4 }
  0x1f   : > { %s185_s5 = scalar_lea.sflag [#allocation6], %s164_s28  ;;  %206 = sbr.rel (%p203_p3) target bundleno = 94 (0x5e), region = 28 }
  0x20   : > { %514 = dma.hbm_to_vmem [thread:$0]  (!%p850_p0), %s196_s4, 64, %s198_s22, %s185_s5  }
  0x21   : > { %s865_s6 = sand.u32 (!%p203_p3), 1, %s741_s13  }
  0x22   : > { %s868_s7 = sshll.u32 (!%p203_p3), %s865_s6, 3  ;;  %s209_s8 = scalar_lea.sflag (!%p203_p3), [#allocation3], %s865_s6 }
  0x23   : > { %s212_s9 = scalar_lea.vmem (!%p203_p3), [#allocation2], %s868_s7 }
  0x24   : > { %720 = dma.done.wait (%p826_p8), %s209_s8, 128  }
  0x25   : > { %722 = vsyncadd (%p826_p8), %s209_s8, 4294967168  ;;  %s491_s28 = sshll.u32 %s865_s6, 2  ;;  %s219_s10 = scalar_lea.sflag [#allocation6], %s865_s6 }
  0x26   : > { %s222_s11 = scalar_lea.vmem [#allocation5], %s491_s28 }
  0x27   : > { %724 = dma.done.wait (%p826_p8), %s219_s10, 64  }
  0x28   : > { %726 = vsyncadd (%p826_p8), %s219_s10, 4294967232  ;;  %v262_v0 = vld [vmem:[%s212_s9] sm:$0xff]  ;;  %v263_v10 = vld [vmem:[%s222_s11] sm:$0xf]  ;;  %s496_s24 = sshll.u32 %s749_s15, 3  ;;  %s255_s23 = scalar_lea.vmem [#allocation8], %s868_s7 }
  0x29   : > { %v265_v1 = vsub.f32 0.0, %v262_v0  ;;  %v264_v14 = vunpack.c.l.bf16 %v263_v10  ;;  %s340_s21 = scalar_lea.hbm %s945_s3, %s496_s24  ;;  %s887_s29 = sshll.u32 %s255_s23, 4  ;;  %s343_s29 = int_to_ptr.vmem [resolvable:$true] %s887_s29 }
  0x2a   : > { %s344_s15 = sshll.u32 %s340_s21, 4  ;;  %s326_s4 = scalar_lea.hbm %s944_s2, %s496_s24  ;;  %s345_s15 = int_to_ptr.hbm [resolvable:$true] %s344_s15 }
  0x2b   : > { %v266_v2 = vmul.f32 1.442695, %v265_v1  ;;  %v293_v21 = vsub.f32 1.0, %v264_v14  ;;  %s248_s5 = scalar_lea.vmem [#allocation7], %s868_s7  ;;  %s330_s9 = sshll.u32 %s326_s4, 4  ;;  %s331_s9 = int_to_ptr.hbm [resolvable:$true] %s330_s9 }
  0x2c   : > { %s894_s8 = sshll.u32 %s248_s5, 4  ;;  %s316_s28 = scalar_lea.sflag [#allocation9], %s865_s6  ;;  %s329_s8 = int_to_ptr.vmem [resolvable:$true] %s894_s8 }
  0x2d   : > { %573 = vpow2.f32 %v266_v2  ;;  %s653_s10 = sshra.s32 %s345_s15, 4  ;;  %s659_s19 = scalar_lea.hbm %s945_s3, 16  ;;  %s654_s10 = int_to_ptr.hbm [resolvable:$true] %s653_s10 }
  0x2e   : > { %s655_s11 = scalar_lea.hbm %s654_s10, 8  ;;  %p660_p7 = scmp.lt.s32.totalorder %s654_s10, %s945_s3 }
  0x2f   : > { %p656_p4 = scmp.ne.s32.totalorder %s654_s10, %s655_s11  ;;  %p661_p8 = scmp.lt.s32.totalorder %s659_s19, %s655_s11 }
  0x31   : > { %p657_p5 = pnand %p656_p4, %p830_p9  ;;  %p662_p10 = por %p661_p8, %p660_p7 }
  0x33   : > { %v574_v3 = vpop.eup %573  ;;  %p658_p6 = pneg %p657_p5 }
  0x34   : > { %v268_v4 = vadd.f32 1.0, %v574_v3 }
  0x35   : > { %p663_p13 = pnand %p662_p10, %p658_p6 }
  0x36   : > { %575 = vrcp.f32 %v268_v4  ;;  %v280_v7 = vand.u32 2147483648, %v268_v4  ;;  %vm274_vm0 = vweird.f32 %v268_v4  ;;  %v278_v9 = vand.u32 2147483647, %v268_v4 }
  0x37   : > { %577 = vlog2.f32 %v268_v4 }
  0x38   : > { %v281_v13 = vor.u32 1.1754944e-38, %v280_v7  ;;  %vm279_vm3 = vcmp.eq.f32.partialorder %v278_v9, 8.507059e+37 }
  0x3c   : > { %v576_v5 = vpop.eup %575 }
  0x3d   : > { %v270_v6 = vmul.f32 %v576_v5, %v268_v4  ;;  %vm275_vm1 = vweird.f32 %v576_v5  ;;  %v578_v11 = vpop.eup %577 }
  0x3e   : > { %vm276_vm2 = vmor %vm274_vm0, %vm275_vm1  ;;  %v285_v16 = vmul.f32 0.6931472, %v578_v11 }
  0x3f   : > { %v271_v8 = vsub.f32 1.0, %v270_v6 }
  0x40   : > { %v295_v23 = vadd.f32 %v285_v16, %v262_v0 }
  0x41   : > { %v272_v12 = vmul.f32 %v576_v5, %v271_v8 }
  0x43   : > { %v273_v15 = vadd.f32 %v576_v5, %v272_v12 }
  0x45   : > { %v277_v17 = vsel %vm276_vm2, %v576_v5, %v273_v15 }
  0x46   : > { %v282_v18 = vsel %vm279_vm3, %v281_v13, %v277_v17 }
  0x47   : > { %v286_v19 = vsub.f32 1.0, %v282_v18  ;;  %v291_v20 = vmul.f32 %v282_v18, %v282_v18  ;;  %v299_v22 = vmul.f32 2.0, %v282_v18 }
  0x49   : > { %v287_v24 = vmul.f32 %v286_v19, %v286_v19  ;;  %v292_v25 = vmul.f32 0.4, %v291_v20  ;;  %v298_v26 = vsub.f32 %v286_v19, %v264_v14  ;;  %v300_v27 = vmul.f32 %v299_v22, %v264_v14 }
  0x4b   : > { %v288_v28 = vmul.f32 0.6, %v287_v24  ;;  %v294_v29 = vmul.f32 %v293_v21, %v292_v25  ;;  %v301_v30 = vadd.f32 %v300_v27, %v298_v26 }
  0x4d   : > { %v289_v31 = vmul.f32 %v288_v28, %v264_v14  ;;  %v296_v32 = vmul.f32 %v295_v23, %v294_v29  ;;  %309 = vst [vmem:[%s255_s23] sm:$0xff] %v301_v30 }
  0x4f   : > { %v290_v33 = vmul.f32 %v289_v31, %v285_v16 }
  0x50   : > { %666 = shalt.err (!%p663_p13)
}
  0x51   : > { %505 = dma.vmem_to_hbm [thread:$0]  (%p830_p9), %s343_s29, 128, %s345_s15, %s316_s28   ;;  %v297_v34 = vadd.f32 %v296_v32, %v290_v33 }
  0x52   : > { %s311_s7 = scalar_lea.sflag [#allocation4], %s865_s6  ;;  %s681_s23 = sshra.s32 %s331_s9, 4  ;;  %s682_s23 = int_to_ptr.hbm [resolvable:$true] %s681_s23 }
  0x53   : > { %305 = vst [vmem:[%s248_s5] sm:$0xff] %v297_v34  ;;  %s683_s22 = scalar_lea.hbm %s682_s23, 8  ;;  %s687_s11 = scalar_lea.hbm %s944_s2, 16 }
  0x54   : > { %p684_p0 = scmp.ne.s32.totalorder %s682_s23, %s683_s22  ;;  %p688_p3 = scmp.lt.s32.totalorder %s682_s23, %s944_s2 }
  0x55   : > { %p689_p4 = scmp.lt.s32.totalorder %s687_s11, %s683_s22 }
  0x56   : > { %p685_p1 = pnand %p684_p0, %p830_p9 }
  0x57   : > { %p690_p5 = por %p689_p4, %p688_p3 }
  0x58   : > { %p686_p2 = pneg %p685_p1 }
  0x5a   : > { %p691_p6 = pnand %p690_p5, %p686_p2 }
  0x5c   : > { %694 = shalt.err (!%p691_p6)
}
  0x5d   : > { %504 = dma.vmem_to_hbm [thread:$0]  (%p830_p9), %s329_s8, 128, %s331_s9, %s311_s7  }
  0x5e PF: > { %s356_s6 = sand.u32 1, %s737_s12   ;;  %p516_p7 = pnand %p484_p12, %p837_p11 }
  0x5f   : > { %s357_s29 = scalar_lea.sflag [#allocation4], %s356_s6 }
  0x60   : > { %p517_p8 = pneg %p516_p7 }
  0x62   : > { %728 = dma.done.wait (%p517_p8), %s357_s29, 128  }
  0x63   : > { %730 = vsyncadd (%p517_p8), %s357_s29, 4294967168  ;;  %s367_s15 = scalar_lea.sflag [#allocation9], %s356_s6 }
  0x64   : > { %732 = dma.done.wait (%p517_p8), %s367_s15, 128  }
  0x65   : > { %734 = vsyncadd (%p517_p8), %s367_s15, 4294967168  ;;  %s26_s17 = sadd.s32 1, %s757_s17   ;;  %s951_s12 = smov %s741_s13 }
  0x66   : > { %p23_p10 = scmp.ge.s32.totalorder %s26_s17, 4   ;;  %s952_s13 = smov %s745_s14 }
  0x67   : > { %s953_s14 = smov %s835_s26  ;;  %s954_s15 = smov %s753_s16 }
  0x68   : > { %s955_s16 = smov %s957_s20  ;;  %25 = sbr.rel (!%p23_p10) target bundleno = 10 (0xa), region = 107 }
  0x6d   :  { %373 = vsyncpa [#allocation3], 1 }
  0x6e   :  { %375 = vsyncpa [#allocation3 + $0x1], 1 }
  0x6f   :  { %376 = vsyncpa [#allocation6], 1 }
  0x70   :  { %378 = vsyncpa [#allocation6 + $0x1], 1 }
  0x71   :  { %379 = vsyncpa [#allocation4], 1 }
  0x72   :  { %381 = vsyncpa [#allocation4 + $0x1], 1 }
  0x73   :  { %382 = vsyncpa [#allocation9], 1 }
  0x74   :  { %384 = vsyncpa [#allocation9 + $0x1], 1 }

</bundles_post_ra>
